<compile_context>
chip_gen: v5e
topology: v5e:2x2
jax: 0.10.0
libtpu: 0.0.40
codegen_flags: <defaults>
</compile_context>

<pallas_src>
import math
import functools

import jax
import jax.numpy as jnp
from jax.experimental import pallas as pl
from jax.experimental.pallas import tpu as pltpu


def _pair(v):
    return (v, v) if isinstance(v, int) else tuple(v)


def _round_up(v, m):
    return ((v + m - 1) // m) * m


def _vmem_capacity_bytes():
    """Reported VMEM capacity; conservative fallback if the query fails."""
    try:
        info = pltpu.get_tpu_info()
        cap = getattr(info, "vmem_capacity_bytes", None)
        if cap:
            return int(cap)
    except Exception:
        pass
    return 64 << 20  # v7x per-core VMEM; safe lower bound everywhere.


def _padded_plane_bytes(h, w, dtype):
    """VMEM bytes actually occupied by one (h, w) plane of `dtype`.

    The last two dims are laid out in (sublane, 128-lane) tiles; sub-32-bit
    dtypes pack more rows per sublane tile (8 rows for 4-byte, 16 for 2-byte,
    32 for 1-byte)."""
    itemsize = jnp.dtype(dtype).itemsize
    sub = max(8, 32 // max(itemsize, 1))
    return _round_up(max(h, 1), sub) * _round_up(max(w, 1), 128) * itemsize


def _pick_tile_p(nc, per_plane_padded, block_budget, target_steps=4):
    """Planes per block: largest divisor of nc whose padded (in+out) block
    bytes fit `block_budget`, while keeping >= min(nc, target_steps) grid
    steps so v7x's two TensorCores each get >= 2 pipelined iterations."""
    cap = max(1, block_budget // max(per_plane_padded, 1))
    steps = min(nc, target_steps)
    if steps > 1:
        cap = min(cap, max(1, nc // steps))
    cap = min(cap, nc)
    for t in range(cap, 0, -1):          # largest divisor of nc <= cap
        if nc % t == 0:
            return t
    return 1


def _same_pad_kernel(x_ref, o_ref, *, pt, pb, plft, prt,
                     h_start, h_stop, w_start, w_stop):
    """One (TILE_P, out_h, out_w) output slab per grid step.

    The padded block is built in registers (zero strips concatenated onto the
    data along W, then zero bands along H) and written with a single
    lane-dense full-tile store.  Negative-pad cropping is a static slice of
    the loaded block."""
    tp, out_h, out_w = o_ref.shape
    dt = o_ref.dtype
    x = x_ref[...]
    if (h_start, h_stop) != (0, x_ref.shape[1]) or \
       (w_start, w_stop) != (0, x_ref.shape[2]):
        x = x[:, h_start:h_stop, w_start:w_stop]        # crop (static slice)
    in_h = h_stop - h_start

    pieces = [x.astype(dt)]
    if plft:
        pieces.insert(0, jnp.zeros((tp, in_h, plft), dt))
    if prt:
        pieces.append(jnp.zeros((tp, in_h, prt), dt))
    rows = jnp.concatenate(pieces, axis=2) if len(pieces) > 1 else pieces[0]

    bands = [rows]
    if pt:
        bands.insert(0, jnp.zeros((tp, pt, out_w), dt))
    if pb:
        bands.append(jnp.zeros((tp, pb, out_w), dt))
    padded = jnp.concatenate(bands, axis=1) if len(bands) > 1 else bands[0]

    o_ref[...] = padded                                   # one full-tile store


def same_pad_2d(x, kernel_size, stride, *, jnp_fallback_max_bytes=0):
    """Exact Pallas port of SamePad2d.forward (NCHW input)."""
    kernel_size = _pair(kernel_size)
    stride = _pair(stride)
    N, C, d2, d3 = x.shape

    # --- Reproduce the module's arithmetic exactly (naming quirk included) ---
    in_width, in_height = d2, d3
    out_width = math.ceil(float(in_width) / float(stride[0]))
    out_height = math.ceil(float(in_height) / float(stride[1]))
    pad_along_width = (out_width - 1) * stride[0] + kernel_size[0] - in_width
    pad_along_height = (out_height - 1) * stride[1] + kernel_size[1] - in_height
    pad_left = math.floor(pad_along_width / 2)
    pad_top = math.floor(pad_along_height / 2)
    pad_right = pad_along_width - pad_left
    pad_bottom = pad_along_height - pad_top

    if pad_left == 0 and pad_right == 0 and pad_top == 0 and pad_bottom == 0:
        return x                                          # true no-op

    # F.pad semantics: (pad_left, pad_right) -> dim -1, (pad_top, pad_bottom)
    # -> dim -2; negative pads crop.
    def _crop_bounds(lo, hi, size):
        start = -lo if lo < 0 else 0
        stop = size + hi if hi < 0 else size
        return start, max(stop, start)

    h_start, h_stop = _crop_bounds(pad_top, pad_bottom, d2)
    w_start, w_stop = _crop_bounds(pad_left, pad_right, d3)
    pt, pb = max(pad_top, 0), max(pad_bottom, 0)
    plft, prt = max(pad_left, 0), max(pad_right, 0)
    in_h, in_w = h_stop - h_start, w_stop - w_start
    out_h = in_h + pt + pb
    out_w = in_w + plft + prt
    nc = N * C
    itemsize = jnp.dtype(x.dtype).itemsize

    def _jnp_path():
        xc = x[:, :, h_start:h_stop, w_start:w_stop]
        return jnp.pad(xc, ((0, 0), (0, 0), (pt, pb), (plft, prt)))

    # --- VMEM accounting on the *tiled* (padded) footprint --------------------
    plane_in = _padded_plane_bytes(d2, d3, x.dtype)       # full uncropped block
    plane_out = _padded_plane_bytes(out_h, out_w, x.dtype)
    per_plane_padded = plane_in + plane_out
    total_bytes = nc * (d2 * d3 + out_h * out_w) * itemsize

    vmem_cap = _vmem_capacity_bytes()
    vmem_ceiling = vmem_cap * 3 // 4                      # leave >=25% headroom
    plane_limit = max(1 << 20, (vmem_ceiling - (16 << 20)) // 4)
    block_budget = max(1 << 20, min(vmem_cap // 10, 12 << 20, plane_limit))

    if (nc == 0 or in_h <= 0 or in_w <= 0 or d2 == 0 or d3 == 0
            or total_bytes <= jnp_fallback_max_bytes
            or per_plane_padded > plane_limit):
        # TODO(synk): for planes too large for VMEM, add a second grid axis
        # over H instead of falling back to XLA's pad.
        return _jnp_path()

    x3 = x.reshape(nc, d2, d3)                            # free: leading dims only
    tile_p = _pick_tile_p(nc, per_plane_padded, block_budget)
    block_bytes = tile_p * per_plane_padded
    # double-buffered in+out blocks + in-register padded value + margin
    vmem_limit = int(min(vmem_ceiling, 4 * block_bytes + (16 << 20)))

    kernel = functools.partial(
        _same_pad_kernel, pt=pt, pb=pb, plft=plft, prt=prt,
        h_start=h_start, h_stop=h_stop, w_start=w_start, w_stop=w_stop)

    out3 = pl.pallas_call(
        kernel,
        out_shape=jax.ShapeDtypeStruct((nc, out_h, out_w), x.dtype),
        grid=(nc // tile_p,),
        in_specs=[pl.BlockSpec((tile_p, d2, d3), lambda p: (p, 0, 0))],
        out_specs=pl.BlockSpec((tile_p, out_h, out_w), lambda p: (p, 0, 0)),
        compiler_params=pltpu.CompilerParams(
            dimension_semantics=("parallel",),
            vmem_limit_bytes=vmem_limit),
        cost_estimate=pl.CostEstimate(
            flops=0, transcendentals=0, bytes_accessed=int(total_bytes)),
    )(x3)
    return out3.reshape(N, C, out_h, out_w)


if __name__ == "__main__":
    key = jax.random.PRNGKey(0)
    x = jax.random.normal(key, (2, 4, 16, 16), dtype=jnp.float32)

    # Case 1: kernel=3, stride=1 -> pad 1 on every side of both spatial dims.
    out = jax.block_until_ready(same_pad_2d(x, 3, 1))
    ref = jnp.pad(x, ((0, 0), (0, 0), (1, 1), (1, 1)))
    assert out.shape == (2, 4, 18, 18), out.shape
    assert out.dtype == x.dtype
    assert jnp.array_equal(out, ref), "mismatch vs reference padding (k=3, s=1)"

    # Case 2: kernel=5, stride=2 -> asymmetric pad (1, 2) on both spatial dims.
    out2 = jax.block_until_ready(same_pad_2d(x, 5, 2))
    ref2 = jnp.pad(x, ((0, 0), (0, 0), (1, 2), (1, 2)))
    assert out2.shape == (2, 4, 19, 19), out2.shape
    assert jnp.array_equal(out2, ref2), "mismatch vs reference padding (k=5, s=2)"

    # Case 3: kernel=1, stride=4 -> negative pads (-2, -1) on both dims, i.e.
    # F.pad crops rows/cols [2:15] (crop folded into the kernel).
    out3 = jax.block_until_ready(same_pad_2d(x, 1, 4))
    ref3 = x[:, :, 2:15, 2:15]
    assert out3.shape == (2, 4, 13, 13), out3.shape
    assert jnp.array_equal(out3, ref3), "mismatch vs reference crop (k=1, s=4)"

    print("KERNEL_OK")
</pallas_src>

<mosaic_0001>
module attributes {stable_mosaic.version = 11 : i64} {
  func.func @_same_pad_kernel(%arg0: i32, %arg1: memref<2x16x16xf32, #tpu.memory_space<vmem>>, %arg2: memref<2x18x18xf32, #tpu.memory_space<vmem>>) attributes {dimension_semantics = [#tpu.dimension_semantics<parallel>], iteration_bounds = array<i64: 4>, scalar_prefetch = 0 : i64, scratch_operands = 0 : i64, tpu.core_type = #tpu.core_type<tc>, window_params = [{transform_indices = @transform_0, window_bounds = array<i64: 2, 16, 16>}, {transform_indices = @transform_1, window_bounds = array<i64: 2, 18, 18>}]} {
    %c0 = arith.constant 0 : index
    %c0_0 = arith.constant 0 : index
    %c0_1 = arith.constant 0 : index
    %0 = vector.load %arg1[%c0, %c0_0, %c0_1] : memref<2x16x16xf32, #tpu.memory_space<vmem>>, vector<2x16x16xf32>
    %cst = arith.constant 0.000000e+00 : f32
    %1 = vector.broadcast %cst : f32 to vector<2x16x1xf32>
    %cst_2 = arith.constant 0.000000e+00 : f32
    %2 = vector.broadcast %cst_2 : f32 to vector<2x16x1xf32>
    %3 = tpu.concatenate %1, %0, %2 in 2 : vector<2x16x1xf32>, vector<2x16x16xf32>, vector<2x16x1xf32> -> vector<2x16x18xf32>
    %cst_3 = arith.constant 0.000000e+00 : f32
    %4 = vector.broadcast %cst_3 : f32 to vector<2x1x18xf32>
    %cst_4 = arith.constant 0.000000e+00 : f32
    %5 = vector.broadcast %cst_4 : f32 to vector<2x1x18xf32>
    %6 = tpu.concatenate %4, %3, %5 in 1 : vector<2x1x18xf32>, vector<2x16x18xf32>, vector<2x1x18xf32> -> vector<2x18x18xf32>
    %c0_5 = arith.constant 0 : index
    %c0_6 = arith.constant 0 : index
    %c0_7 = arith.constant 0 : index
    %7 = vector.load %arg2[%c0_5, %c0_6, %c0_7] : memref<2x18x18xf32, #tpu.memory_space<vmem>>, vector<2x18x18xf32>
    tpu.vector_store %arg2[%c0_5, %c0_6, %c0_7], %6 {strides = array<i32>} : memref<2x18x18xf32, #tpu.memory_space<vmem>>, vector<2x18x18xf32>,
    return
  }
  func.func @transform_0(%arg0: i32) -> (i32, i32, i32) {
    %c0_i32 = arith.constant 0 : i32
    %c0_i32_0 = arith.constant 0 : i32
    %c0_i32_1 = arith.constant 0 : i32
    return %arg0, %c0_i32, %c0_i32_0 : i32, i32, i32
  }
  func.func @transform_1(%arg0: i32) -> (i32, i32, i32) {
    %c0_i32 = arith.constant 0 : i32
    %c0_i32_0 = arith.constant 0 : i32
    %c0_i32_1 = arith.constant 0 : i32
    return %arg0, %c0_i32, %c0_i32_0 : i32, i32, i32
  }
}

</mosaic_0001>

<bundles_post_ra>
// kernel: tpu_custom_call.1
= control target key start
LH: loop header
LB: loop body
LE: loop exit
PB: predicated region body
PF: predicated region fallthrough
CT: control target
= control target key end

     0   :  { %6 = vsyncpa [#allocation3], 0  ;;  %s519_s0 = inlined_call_operand.hbm [shape: f32[8,16,16], index: 0, kind: input, shape index: {}]   ;;  %s520_s1 = inlined_call_operand.vmem [shape: f32[8,18,18], index: 1, kind: output, shape index: {}]  }
   0x1   :  { %8 = vsyncpa [#allocation3 + $0x1], 0  ;;  %s410_s6 = smov 0   ;;  %s412_s7 = smov 0  }
   0x2   :  { %s414_s8 = smov 0   ;;  %s416_s9 = smov 0  }
   0x3 LB: > { %s272_s10 = sadd.s32 4294967295, %s395_s9   ;;  %s430_s11 = sadd.s32 1, %s395_s9   ;;  %s395_s9 = sphi %s416_s9, %s527_s9   ;;  %s391_s8 = sphi %s414_s8, %s526_s8   ;;  %s387_s7 = sphi %s412_s7, %s525_s7   ;;  %s383_s6 = sphi %s410_s6, %s524_s6  }
   0x4   : > { %s18_s12 = ssub.s32 %s395_s9, %s430_s11  ;;  %s21_s13 = sadd.s32 1, %s391_s8 }
   0x5   : > { %p19_p0 = scmp.eq.s32.totalorder %s18_s12, 0  ;;  %p28_p1 = scmp.ne.s32.totalorder %s391_s8, %s387_s7 }
   0x6   : > { %p29_p2 = scmp.eq.s32.totalorder %s395_s9, 0  ;;  %p34_p3 = scmp.ne.s32.totalorder %s387_s7, %s383_s6 }
   0x7   : > { %s440_s14 = scalar_select %p19_p0, %s391_s8, %s21_s13  }
   0x8   : > { %p442_p4 = por %p29_p2, %p28_p1  ;;  %p35_p5 = scmp.eq.s32.totalorder %s272_s10, 0 }
   0x9   : > { %p295_p6 = scmp.lt.s32.totalorder %s395_s9, 4  ;;  %s84_s17 = sand.u32 1, %s391_s8  }
   0xa   : > { %p449_p7 = por %p35_p5, %p34_p3  ;;  %s276_s18 = sshll.u32 %s84_s17, 5 }
   0xb   : > { %s287_s19 = sshll.u32 %s395_s9, 5  ;;  %s88_s23 = scalar_lea.vmem [#allocation2], %s276_s18 }
   0xc   : > { %s94_s22 = scalar_lea.hbm %s519_s0, %s287_s19  ;;  %s97_s24 = sshll.u32 %s88_s23, 4  ;;  %s98_s24 = int_to_ptr.vmem [resolvable:$true] %s97_s24 }
   0xd   : > { %s95_s25 = sshll.u32 %s94_s22, 4  ;;  %p460_p8 = pnand %p295_p6, %p442_p4  ;;  %s96_s25 = int_to_ptr.hbm [resolvable:$true] %s95_s25 }
   0xe   : > { %p280_p9 = scmp.ge.s32.totalorder %s395_s9, 1  ;;  %s85_s27 = scalar_lea.sflag [#allocation3], %s84_s17 }
   0xf   : > { %s331_s28 = sshra.s32 %s96_s25, 4  ;;  %p335_p11 = pneg %p460_p8  ;;  %s332_s28 = int_to_ptr.hbm [resolvable:$true] %s331_s28 }
  0x10   : > { %s333_s29 = scalar_lea.hbm %s332_s28, 32  ;;  %s338_s3 = scalar_lea.hbm %s519_s0, 128 }
  0x11   : > { %p334_p10 = scmp.ne.s32.totalorder %s332_s28, %s333_s29  ;;  %p339_p0 = scmp.lt.s32.totalorder %s332_s28, %s519_s0 }
  0x12   : > { %p340_p1 = scmp.lt.s32.totalorder %s338_s3, %s333_s29 }
  0x13   : > { %p336_p12 = pnand %p335_p11, %p334_p10 }
  0x14   : > { %p341_p2 = por %p340_p1, %p339_p0 }
  0x15   : > { %p337_p13 = pneg %p336_p12 }
  0x17   : > { %p342_p3 = pnand %p341_p2, %p337_p13 }
  0x19   : > { %345 = shalt.err (!%p342_p3)
}
  0x1a   : > { %s397_s6 = smov 128   ;;  %s398_s12 = smov 8  }
  0x1b   : > { %294 = dma.hbm_to_vmem [thread:$0]  (!%p460_p8), %s96_s25, 512, %s98_s24, %s85_s27, %s397_s6, %s397_s6, %s398_s12  }
  0x1c   : > { %p105_p4 = scmp.lt.s32.totalorder %s395_s9, 5 }
  0x1e   : > { %p106_p5 = pnand %p280_p9, %p105_p4 }
  0x1f   : > { %s111_s13 = sand.u32 (!%p106_p5), 1, %s387_s7  }
  0x20   : > { %109 = sbr.rel (%p106_p5) target bundleno = 171 (0xab), region = 24  ;;  %s281_s15 = sshll.u32 (!%p106_p5), %s111_s13, 5 }
  0x21   : > { %s112_s17 = scalar_lea.sflag (!%p106_p5), [#allocation3], %s111_s13  ;;  %s115_s18 = scalar_lea.vmem (!%p106_p5), [#allocation2], %s281_s15 }
  0x25   : > { %378 = dma.done.wait (%p449_p7), %s112_s17, 512  }
  0x26   : > { %380 = vsyncadd (%p449_p7), %s112_s17, 4294966784  ;;  %v146_v0 = vld [vmem:[%s115_s18 + $0x10] sm:$0xff]  ;;  %v144_v1 = vld [vmem:[%s115_s18] sm:$0xff]  ;;  %s399_s19 = smov 1   ;;  %s282_s20 = sshll.u32 %s272_s10, 1  ;;  %vm164_vm0 = vcmask 7168  }
  0x27   : > { %156 = vrot.lane.b32.xlu1 %v146_v0, %s399_s19  ;;  %152 = vrot.lane.b32.xlu0 %v144_v1, %s399_s19  ;;  %v147_v2 = vld [vmem:[%s115_s18 + $0x18] sm:$0xff]  ;;  %v145_v3 = vld [vmem:[%s115_s18 + $0x8] sm:$0xff]  ;;  %p138_p6 = scmp.lt.s32.totalorder %s282_s20, 7  ;;  %vm169_vm1 = vcmask 138240   ;;  %vm178_vm2 = vcmask 1040384   ;;  %vm195_vm3 = vcmask 146432  }
  0x28   : > { %vm198_vm4 = vcmask 140288  }
  0x29   : > { %s529_s20 = smov (!%p138_p6, %s282_s20), 7 }
  0x2a   : > { %s288_s21 = smul.u32 24, %s529_s20 }
  0x2c   : > { %s142_s10 = scalar_lea.vmem %s520_s1, %s288_s21 }
  0x2f   : > { %158 = vrot.lane.b32.xlu1 %v147_v2, %s399_s19  ;;  %154 = vrot.lane.b32.xlu0 %v145_v3, %s399_s19 }
  0x99   : > { %v157_v4 = vpop.permute.xlu1 %156  ;;  %v153_v5 = vpop.permute.xlu0 %152 }
  0x9a   : > { %v167_v6 = vsel %vm164_vm0, 0.0, %v157_v4  ;;  %v165_v7 = vsel %vm164_vm0, 0.0, %v153_v5 }
  0x9b   : > { %v172_v8 = vsel %vm169_vm1, %v167_v6, 0.0  ;;  %v170_v9 = vsel %vm169_vm1, %v165_v7, 0.0 }
  0x9c   : > { %v182_v10 = vrot.slane %v172_v8, 7  ;;  %v179_v11 = vrot.slane %v170_v9, 7 }
  0x9e   : > { %v192_v12 = vsel %vm178_vm2, 0.0, %v182_v10  ;;  %v191_v13 = vsel %vm178_vm2, 0.0, %v179_v11 }
  0x9f   : > { %196 = vst.msk [vmem:[%s142_s10] sm:$0xff] %vm195_vm3, %v191_v13 }
  0xa0   : > { %200 = vst.msk [vmem:[%s142_s10 + $0x18] sm:$0xff] %vm195_vm3, %v192_v12 }
  0xa1   : > { %v159_v14 = vpop.permute.xlu1 %158  ;;  %v155_v15 = vpop.permute.xlu0 %154 }
  0xa2   : > { %v168_v16 = vsel %vm164_vm0, 0.0, %v159_v14  ;;  %v166_v17 = vsel %vm164_vm0, 0.0, %v155_v15 }
  0xa3   : > { %v173_v18 = vsel %vm169_vm1, %v168_v16, 0.0  ;;  %v171_v19 = vsel %vm169_vm1, %v166_v17, 0.0 }
  0xa4   : > { %v183_v20 = vrot.slane %v173_v18, 7  ;;  %v180_v21 = vrot.slane %v171_v19, 7 }
  0xa6   : > { %v184_v22 = vsel %vm178_vm2, %v182_v10, %v183_v20  ;;  %v181_v23 = vsel %vm178_vm2, %v179_v11, %v180_v21  ;;  %v193_v24 = vsel %vm178_vm2, %v180_v21, 0.0  ;;  %v194_v25 = vsel %vm178_vm2, %v183_v20, 0.0 }
  0xa7   : > { %197 = vst.msk [vmem:[%s142_s10 + $0x8] sm:$0xff] %vm195_vm3, %v181_v23 }
  0xa8   : > { %199 = vst.msk [vmem:[%s142_s10 + $0x10] sm:$0x3] %vm198_vm4, %v193_v24 }
  0xa9   : > { %201 = vst.msk [vmem:[%s142_s10 + $0x20] sm:$0xff] %vm195_vm3, %v184_v22 }
  0xaa   : > { %202 = vst.msk [vmem:[%s142_s10 + $0x28] sm:$0x3] %vm198_vm4, %v194_v25 }
  0xab PF: > { %p11_p7 = scmp.ge.s32.totalorder %s430_s11, 6   ;;  %s524_s6 = smov %s387_s7 }
  0xac   : > { %s525_s7 = smov %s391_s8  ;;  %s526_s8 = smov %s440_s14 }
  0xad   : > { %s527_s9 = smov %s430_s11  ;;  %13 = sbr.rel (!%p11_p7) target bundleno = 3 (0x3), region = 64 }
  0xb2   :  { %227 = vsyncpa [#allocation3], 1 }
  0xb3   :  { %229 = vsyncpa [#allocation3 + $0x1], 1 }

</bundles_post_ra>
